<compile_context>
chip_gen: v6e
topology: v6e:2x2x1
jax: 0.10.0
libtpu: 0.0.40
codegen_flags: <defaults>
</compile_context>

<pallas_src>
import functools

import jax
import jax.numpy as jnp
from jax.experimental import pallas as pl
from jax.experimental.pallas import tpu as pltpu

IN_FEATURES = 5
HIDDEN = 8


def _round_up(n, m):
    return ((n + m - 1) // m) * m


def mlp_kernel(xT_ref, w1_ref, b1_ref, w2_ref, b2_ref, o_ref):
    """One batch tile (transposed layout: batch on the lane axis)."""
    xT = xT_ref[...]                 # (5, TB)  f32
    w1 = w1_ref[...]                 # (8, 5)   torch (out, in) layout

    # Layer 1: h[j, b] = b1[j] + sum_i w1[j, i] * x[i, b]
    # Unrolled 5-term broadcast FMA chain on the VPU (K=5 would waste the MXU).
    h = w1[:, 0:1] * xT[0:1, :]                       # (8,1)*(1,TB) -> (8,TB)
    for i in range(1, IN_FEATURES):                   # static unroll
        h = h + w1[:, i:i + 1] * xT[i:i + 1, :]
    h = jnp.maximum(h + b1_ref[...], 0.0)             # + bias (8,1), ReLU

    # Layer 2: out[0, b] = b2 + sum_j w2[j] * h[j, b]   (sublane reduce, XLU)
    out = jnp.sum(w2_ref[...] * h, axis=0, keepdims=True) + b2_ref[...]  # (1,TB)
    o_ref[...] = out.astype(o_ref.dtype)              # lane-dense store


@functools.partial(jax.jit, static_argnames=("block_b",))
def my_neural_net(x, w1, b1, w2, b2, *, block_b=2048):
    """Forward pass of MyNeuralNet.

    x : (B, 5) f32
    w1: (8, 5), b1: (8,), w2: (1, 8), b2: (1,)   (PyTorch nn.Linear layout)
    Returns (B, 1) f32.
    """
    B = x.shape[0]
    # Batch tile (lane axis): biggest of up to `block_b`, 128-aligned.
    TB = min(block_b, _round_up(B, 128))
    Bp = _round_up(B, TB)

    xT = jnp.transpose(x)                       # (5, B) — batch on lane axis
    if Bp != B:
        xT = jnp.pad(xT, ((0, 0), (0, Bp - B)))

    b1c = b1.reshape(HIDDEN, 1)                 # (8, 1)
    w2c = w2.reshape(HIDDEN, 1)                 # (1, 8) -> column (8, 1)
    b2c = b2.reshape(1, 1)                      # (1, 1)

    grid = (Bp // TB,)
    # Constant index maps -> parameters stay resident in VMEM across grid steps.
    const = lambda a: pl.BlockSpec(a.shape, lambda i: (0,) * a.ndim)

    outT = pl.pallas_call(
        mlp_kernel,
        out_shape=jax.ShapeDtypeStruct((1, Bp), jnp.float32),
        grid=grid,
        in_specs=[
            pl.BlockSpec((IN_FEATURES, TB), lambda i: (0, i)),   # x tile (5, TB)
            const(w1), const(b1c), const(w2c), const(b2c),
        ],
        out_specs=pl.BlockSpec((1, TB), lambda i: (0, i)),       # (1, TB) lane-dense
        compiler_params=pltpu.CompilerParams(
            dimension_semantics=("parallel",),   # shard batch steps across TCs (v7x)
        ),
        cost_estimate=pl.CostEstimate(
            flops=2 * B * (IN_FEATURES * HIDDEN + HIDDEN),
            transcendentals=0,
            bytes_accessed=(IN_FEATURES + 1) * 4 * B,            # x in + out, f32
        ),
    )(xT, w1, b1c, w2c, b2c)

    # (1, Bp) -> (B, 1): slice off padding and reshape (free, same memory order).
    return outT[:, :B].reshape(B, 1)


def init_params(key):
    """Deterministic init matching torch's nn.Linear parameter layout/scheme."""
    k1, k2, k3, k4 = jax.random.split(key, 4)
    lim1 = 1.0 / jnp.sqrt(float(IN_FEATURES))
    lim2 = 1.0 / jnp.sqrt(float(HIDDEN))
    w1 = jax.random.uniform(k1, (HIDDEN, IN_FEATURES), jnp.float32, -lim1, lim1)
    b1 = jax.random.uniform(k2, (HIDDEN,), jnp.float32, -lim1, lim1)
    w2 = jax.random.uniform(k3, (1, HIDDEN), jnp.float32, -lim2, lim2)
    b2 = jax.random.uniform(k4, (1,), jnp.float32, -lim2, lim2)
    return w1, b1, w2, b2


if __name__ == "__main__":
    key = jax.random.PRNGKey(0)
    kx, kp = jax.random.split(key)
    B = 8
    x = jax.random.normal(kx, (B, IN_FEATURES), dtype=jnp.float32)
    w1, b1, w2, b2 = init_params(kp)

    out = my_neural_net(x, w1, b1, w2, b2)
    out = jax.block_until_ready(out)

    # Pure-JAX reference of the same forward pass (torch layout weights).
    ref = jnp.maximum(x @ w1.T + b1, 0.0) @ w2.T + b2
    assert out.shape == (B, 1)
    assert jnp.allclose(out, ref, atol=1e-5, rtol=1e-5)
    print("KERNEL_OK")
</pallas_src>

<mosaic_0001>
module attributes {stable_mosaic.version = 11 : i64} {
  func.func @mlp_kernel(%arg0: i32, %arg1: memref<5x128xf32, #tpu.memory_space<vmem>>, %arg2: memref<8x5xf32, #tpu.memory_space<vmem>>, %arg3: memref<8x1xf32, #tpu.memory_space<vmem>>, %arg4: memref<8x1xf32, #tpu.memory_space<vmem>>, %arg5: memref<1x1xf32, #tpu.memory_space<vmem>>, %arg6: memref<1x128xf32, #tpu.memory_space<vmem>>) attributes {dimension_semantics = [#tpu.dimension_semantics<parallel>], iteration_bounds = array<i64: 1>, scalar_prefetch = 0 : i64, scratch_operands = 0 : i64, tpu.core_type = #tpu.core_type<tc>, window_params = [{transform_indices = @transform_0, window_bounds = array<i64: 5, 128>}, {pipeline_mode = #tpu.pipeline_mode<synchronous>, transform_indices = @transform_1, window_bounds = array<i64: 8, 5>}, {pipeline_mode = #tpu.pipeline_mode<synchronous>, transform_indices = @transform_2, window_bounds = array<i64: 8, 1>}, {pipeline_mode = #tpu.pipeline_mode<synchronous>, transform_indices = @transform_3, window_bounds = array<i64: 8, 1>}, {pipeline_mode = #tpu.pipeline_mode<synchronous>, transform_indices = @transform_4, window_bounds = array<i64: 1, 1>}, {transform_indices = @transform_5, window_bounds = array<i64: 1, 128>}]} {
    %c0 = arith.constant 0 : index
    %c0_0 = arith.constant 0 : index
    %0 = vector.load %arg1[%c0, %c0_0] : memref<5x128xf32, #tpu.memory_space<vmem>>, vector<5x128xf32>
    %c0_1 = arith.constant 0 : index
    %c0_2 = arith.constant 0 : index
    %1 = vector.load %arg2[%c0_1, %c0_2] : memref<8x5xf32, #tpu.memory_space<vmem>>, vector<8x5xf32>
    %2 = vector.extract_strided_slice %1 {offsets = [0, 0], sizes = [8, 1], strides = [1, 1]} : vector<8x5xf32> to vector<8x1xf32>
    %3 = vector.extract_strided_slice %0 {offsets = [0, 0], sizes = [1, 128], strides = [1, 1]} : vector<5x128xf32> to vector<1x128xf32>
    %4 = vector.broadcast %2 : vector<8x1xf32> to vector<8x128xf32>
    %5 = vector.broadcast %3 : vector<1x128xf32> to vector<8x128xf32>
    %6 = arith.mulf %4, %5 : vector<8x128xf32>
    %7 = vector.extract_strided_slice %1 {offsets = [0, 1], sizes = [8, 1], strides = [1, 1]} : vector<8x5xf32> to vector<8x1xf32>
    %8 = vector.extract_strided_slice %0 {offsets = [1, 0], sizes = [1, 128], strides = [1, 1]} : vector<5x128xf32> to vector<1x128xf32>
    %9 = vector.broadcast %7 : vector<8x1xf32> to vector<8x128xf32>
    %10 = vector.broadcast %8 : vector<1x128xf32> to vector<8x128xf32>
    %11 = arith.mulf %9, %10 : vector<8x128xf32>
    %12 = arith.addf %6, %11 : vector<8x128xf32>
    %13 = vector.extract_strided_slice %1 {offsets = [0, 2], sizes = [8, 1], strides = [1, 1]} : vector<8x5xf32> to vector<8x1xf32>
    %14 = vector.extract_strided_slice %0 {offsets = [2, 0], sizes = [1, 128], strides = [1, 1]} : vector<5x128xf32> to vector<1x128xf32>
    %15 = vector.broadcast %13 : vector<8x1xf32> to vector<8x128xf32>
    %16 = vector.broadcast %14 : vector<1x128xf32> to vector<8x128xf32>
    %17 = arith.mulf %15, %16 : vector<8x128xf32>
    %18 = arith.addf %12, %17 : vector<8x128xf32>
    %19 = vector.extract_strided_slice %1 {offsets = [0, 3], sizes = [8, 1], strides = [1, 1]} : vector<8x5xf32> to vector<8x1xf32>
    %20 = vector.extract_strided_slice %0 {offsets = [3, 0], sizes = [1, 128], strides = [1, 1]} : vector<5x128xf32> to vector<1x128xf32>
    %21 = vector.broadcast %19 : vector<8x1xf32> to vector<8x128xf32>
    %22 = vector.broadcast %20 : vector<1x128xf32> to vector<8x128xf32>
    %23 = arith.mulf %21, %22 : vector<8x128xf32>
    %24 = arith.addf %18, %23 : vector<8x128xf32>
    %25 = vector.extract_strided_slice %1 {offsets = [0, 4], sizes = [8, 1], strides = [1, 1]} : vector<8x5xf32> to vector<8x1xf32>
    %26 = vector.extract_strided_slice %0 {offsets = [4, 0], sizes = [1, 128], strides = [1, 1]} : vector<5x128xf32> to vector<1x128xf32>
    %27 = vector.broadcast %25 : vector<8x1xf32> to vector<8x128xf32>
    %28 = vector.broadcast %26 : vector<1x128xf32> to vector<8x128xf32>
    %29 = arith.mulf %27, %28 : vector<8x128xf32>
    %30 = arith.addf %24, %29 : vector<8x128xf32>
    %c0_3 = arith.constant 0 : index
    %c0_4 = arith.constant 0 : index
    %31 = vector.load %arg3[%c0_3, %c0_4] : memref<8x1xf32, #tpu.memory_space<vmem>>, vector<8x1xf32>
    %32 = vector.broadcast %31 : vector<8x1xf32> to vector<8x128xf32>
    %33 = arith.addf %30, %32 : vector<8x128xf32>
    %cst = arith.constant 0.000000e+00 : f32
    %34 = vector.broadcast %cst : f32 to vector<8x128xf32>
    %35 = arith.maximumf %33, %34 : vector<8x128xf32>
    %c0_5 = arith.constant 0 : index
    %c0_6 = arith.constant 0 : index
    %36 = vector.load %arg4[%c0_5, %c0_6] : memref<8x1xf32, #tpu.memory_space<vmem>>, vector<8x1xf32>
    %37 = vector.broadcast %36 : vector<8x1xf32> to vector<8x128xf32>
    %38 = arith.mulf %37, %35 : vector<8x128xf32>
    %cst_7 = arith.constant dense<0.000000e+00> : vector<128xf32>
    %39 = vector.multi_reduction <add>, %38, %cst_7 [0] : vector<8x128xf32> to vector<128xf32>
    %40 = vector.shape_cast %39 : vector<128xf32> to vector<1x128xf32>
    %c0_8 = arith.constant 0 : index
    %c0_9 = arith.constant 0 : index
    %41 = vector.load %arg5[%c0_8, %c0_9] : memref<1x1xf32, #tpu.memory_space<vmem>>, vector<1x1xf32>
    %42 = vector.broadcast %41 : vector<1x1xf32> to vector<1x128xf32>
    %43 = arith.addf %40, %42 : vector<1x128xf32>
    %c0_10 = arith.constant 0 : index
    %c0_11 = arith.constant 0 : index
    %44 = vector.load %arg6[%c0_10, %c0_11] : memref<1x128xf32, #tpu.memory_space<vmem>>, vector<1x128xf32>
    tpu.vector_store %arg6[%c0_10, %c0_11], %43 {strides = array<i32>} : memref<1x128xf32, #tpu.memory_space<vmem>>, vector<1x128xf32>,
    return
  }
  func.func @transform_0(%arg0: i32) -> (i32, i32) {
    %c0_i32 = arith.constant 0 : i32
    %c0_i32_0 = arith.constant 0 : i32
    return %c0_i32, %arg0 : i32, i32
  }
  func.func @transform_1(%arg0: i32) -> (i32, i32) {
    %c0_i32 = arith.constant 0 : i32
    %c0_i32_0 = arith.constant 0 : i32
    %c0_i32_1 = arith.constant 0 : i32
    return %c0_i32, %c0_i32_0 : i32, i32
  }
  func.func @transform_2(%arg0: i32) -> (i32, i32) {
    %c0_i32 = arith.constant 0 : i32
    %c0_i32_0 = arith.constant 0 : i32
    %c0_i32_1 = arith.constant 0 : i32
    return %c0_i32, %c0_i32_0 : i32, i32
  }
  func.func @transform_3(%arg0: i32) -> (i32, i32) {
    %c0_i32 = arith.constant 0 : i32
    %c0_i32_0 = arith.constant 0 : i32
    %c0_i32_1 = arith.constant 0 : i32
    return %c0_i32, %c0_i32_0 : i32, i32
  }
  func.func @transform_4(%arg0: i32) -> (i32, i32) {
    %c0_i32 = arith.constant 0 : i32
    %c0_i32_0 = arith.constant 0 : i32
    %c0_i32_1 = arith.constant 0 : i32
    return %c0_i32, %c0_i32_0 : i32, i32
  }
  func.func @transform_5(%arg0: i32) -> (i32, i32) {
    %c0_i32 = arith.constant 0 : i32
    %c0_i32_0 = arith.constant 0 : i32
    return %c0_i32, %arg0 : i32, i32
  }
}

</mosaic_0001>

<bundles_post_ra>
// kernel: my_neural_net.1
= control target key start
LH: loop header
LB: loop body
LE: loop exit
PB: predicated region body
PF: predicated region fallthrough
CT: control target
= control target key end

     0   :  { %v123_v0 = vmov 2   ;;  %v124_v1 = vmov 0   ;;  %v125_v4 = vmov 3   ;;  %v126_v5 = vmov 1   ;;  %s176_s1 = inlined_call_operand.vmem [shape: f32[8,5], index: 1, kind: input, shape index: {}]   ;;  %s177_s4 = inlined_call_operand.<no memory space> [shape: f32[1,1], index: 4, kind: input, shape index: {}]   ;;  %s178_s2 = inlined_call_operand.vmem [shape: f32[8,1], index: 2, kind: input, shape index: {}]   ;;  %s179_s3 = inlined_call_operand.vmem [shape: f32[8,1], index: 3, kind: input, shape index: {}]   ;;  %s180_s0 = inlined_call_operand.vmem [shape: f32[5,128], index: 0, kind: input, shape index: {}]   ;;  %s181_s5 = inlined_call_operand.vmem [shape: f32[1,128], index: 5, kind: output, shape index: {}]  }
   0x1   :  { %118 = vset.pattern.permute.xlu1 %v123_v0  ;;  %116 = vset.pattern.permute.xlu0 %v124_v1  ;;  %v23_v2 = vld [vmem:[%s176_s1] sm:$0xff]  ;;  %v10_v3 = vstv %s177_s4  ;;  %v127_v7 = vmov 4   ;;  %v29_v10 = vlaneseq }
   0x2   :  { %45 = vperm.xlu1 %118, %v23_v2   ;;  %26 = vperm.xlu0 %116, %v23_v2   ;;  %11 = vst [vmem:[#allocation2] sm:$0x1] %v10_v3  ;;  %v74_v6 = vld [vmem:[%s178_s2] sm:$0xff] }
   0x3   :  { %v82_v8 = vld [vmem:[%s179_s3] sm:$0xff]  ;;  %v30_v11 = vshrl.u32 %v29_v10, 7 }
   0x4   :  { %v22_v14 = vld [vmem:[%s180_s0] sm:$0x1f] }
   0x5   :  { %v31_v12 = vsub.s32 0, %v30_v11  ;;  %v40_v13 = vsub.s32 1, %v30_v11  ;;  %v50_v16 = vsub.s32 2, %v30_v11  ;;  %v60_v20 = vsub.s32 3, %v30_v11 }
   0x6   :  { %119 = vset.pattern.permute.xlu1 %v125_v4  ;;  %117 = vset.pattern.permute.xlu0 %v126_v5  ;;  %v70_v21 = vsub.s32 4, %v30_v11 }
   0x7   :  { %55 = vperm.xlu1 %119, %v23_v2   ;;  %35 = vperm.xlu0 %117, %v23_v2   ;;  %v32_v18 = vrot.slane %v22_v14, %v31_v12  ;;  %v41_v19 = vrot.slane %v22_v14, %v40_v13  ;;  %v51_v22 = vrot.slane %v22_v14, %v50_v16 }
   0x8   :  { %v61_v27 = vrot.slane %v22_v14, %v60_v20  ;;  %v71_v28 = vrot.slane %v22_v14, %v70_v21 }
   0x9   :  { %v95_v9 = vld [vmem:[#allocation2] sm:$0x1] }
   0xb   :  { %120 = vset.pattern.permute.xlu1 %v127_v7  ;;  %121 = vset.pattern.permute.xlu0 %v124_v1 }
   0xc   :  { %65 = vperm.xlu1 %120, %v23_v2   ;;  %77 = vperm.xlu0 %121, %v74_v6  }
  0x10   :  { %122 = vset.pattern.permute.xlu1 %v124_v1 }
  0x11   :  { %85 = vperm.xlu1 %122, %v82_v8  }
  0x15   :  { %98 = vperm.xlu1 %122, %v95_v9  }
  0x7d   :  { %v27_v15 = vpop.permute.xlu0 %26  ;;  %v46_v17 = vpop.permute.xlu1 %45 }
  0x7e   :  { %v33_v25 = vmul.f32 %v32_v18, %v27_v15  ;;  %v52_v29 = vmul.f32 %v51_v22, %v46_v17 }
  0x82   :  { %v36_v23 = vpop.permute.xlu0 %35  ;;  %v56_v24 = vpop.permute.xlu1 %55 }
  0x83   :  { %v42_v26 = vmul.f32 %v41_v19, %v36_v23  ;;  %v62_v32 = vmul.f32 %v61_v27, %v56_v24 }
  0x85   :  { %v43_v30 = vadd.f32 %v42_v26, %v33_v25 }
  0x87   :  { %v53_v31 = vadd.f32 %v52_v29, %v43_v30  ;;  %v66_v33 = vpop.permute.xlu1 %65  ;;  %v78_v36 = vpop.permute.xlu0 %77 }
  0x88   :  { %v72_v34 = vmul.f32 %v71_v28, %v66_v33 }
  0x89   :  { %v63_v35 = vadd.f32 %v62_v32, %v53_v31 }
  0x8b   :  { %v73_v37 = vadd.f32 %v72_v34, %v63_v35 }
  0x8c   :  { %v86_v40 = vpop.permute.xlu1 %85 }
  0x8d   :  { %v80_v38 = vadd.f32 %v78_v36, %v73_v37 }
  0x8f   :  { %v81_v39 = vmax.f32 %v80_v38, 0.0 }
  0x90   :  { %v99_v46 = vpop.permute.xlu1 %98 }
  0x91   :  { %v88_v41 = vmul.f32 %v86_v40, %v81_v39  ;;  %v104_v49 = vrot.slane %v99_v46, %v31_v12 }
  0x93   :  { %v89_v42 = vrot.slane %v88_v41, 4 }
  0x95   :  { %v90_v43 = vadd.f32 %v89_v42, %v88_v41 }
  0x97   :  { %v91_v44 = vrot.slane %v90_v43, 2 }
  0x99   :  { %v92_v45 = vadd.f32 %v91_v44, %v90_v43 }
  0x9b   :  { %v93_v47 = vrot.slane %v92_v45, 1 }
  0x9d   :  { %v94_v48 = vadd.f32 %v93_v47, %v92_v45 }
  0x9f   :  { %v105_v50 = vadd.f32 %v104_v49, %v94_v48 }
  0xa1   :  { %106 = vst [vmem:[%s181_s5] sm:$0x1] %v105_v50 }

</bundles_post_ra>
